<compile_context>
chip_gen: v6e
topology: v6e:2x2x1
jax: 0.10.0
libtpu: 0.0.40
codegen_flags: <defaults>
</compile_context>

<pallas_src>
import jax
import jax.numpy as jnp
from jax.experimental import pallas as pl
from jax.experimental.pallas import tpu as pltpu

FEAT = 1000          # torchvision ImageNet-logit width (both backbones end at 1000)
LANE = 128


def _head_kernel(x_ref, w_ref, b_ref, o_ref):
    # x: (B, 1000)   w: (1000, Cpad)   b: (1, Cpad)   o: (B, Cpad)
    out = jnp.dot(x_ref[...], w_ref[...], preferred_element_type=jnp.float32) + b_ref[...]
    o_ref[...] = out.astype(o_ref.dtype)          # dropout == identity (eval mode)


def image_head_forward(backbone_out, w, b):
    """dropout(Linear(1000, num_classes)(backbone_out)) with dropout == identity."""
    B, F = backbone_out.shape
    C = w.shape[0]
    c_pad = max(LANE, ((C + LANE - 1) // LANE) * LANE)

    # (C, 1000) -> (1000, Cpad), zero-padded so the kernel output store is lane-dense.
    w_t = jnp.zeros((F, c_pad), jnp.float32).at[:, :C].set(jnp.transpose(w))
    b_p = jnp.zeros((1, c_pad), jnp.float32).at[:, :C].set(b.reshape(1, C))

    out_pad = pl.pallas_call(
        _head_kernel,
        out_shape=jax.ShapeDtypeStruct((B, c_pad), jnp.float32),
        grid_spec=pltpu.PrefetchScalarGridSpec(
            num_scalar_prefetch=0,
            grid=(1,),                                     # whole batch in one step
            in_specs=[
                pl.BlockSpec((B, F), lambda i: (0, 0)),       # features, resident
                pl.BlockSpec((F, c_pad), lambda i: (0, 0)),   # weight, resident
                pl.BlockSpec((1, c_pad), lambda i: (0, 0)),   # bias, resident
            ],
            out_specs=pl.BlockSpec((B, c_pad), lambda i: (0, 0)),
        ),
        compiler_params=pltpu.CompilerParams(dimension_semantics=("arbitrary",)),
    )(backbone_out, w_t, b_p)
    return out_pad[:, :C]


def image_model_forward(backbone_out, params, image_model_type):
    # The two branches of the PyTorch forward differ only in which frozen backbone
    # produced `backbone_out`; the module's own computation (linear + dropout) is
    # identical, so both branches run the same fused Pallas head kernel.
    if image_model_type not in ("resnet", "vgg"):
        raise ValueError(image_model_type)
    return image_head_forward(backbone_out, params["linear_w"], params["linear_b"])


if __name__ == "__main__":
    # args: num_classes=4, dropout_rate=0.5; batch=2.
    B, C = 2, 4
    key = jax.random.PRNGKey(0)
    kf, kw, kb = jax.random.split(key, 3)

    # Stand-in for `resnet152(images)` / `vgg19(images)`: the frozen backbones'
    # (B, 1000) logits (pretrained backbone weights are not available in-sandbox).
    backbone_out = jax.random.normal(kf, (B, FEAT), jnp.float32)
    scale = float(FEAT) ** -0.5
    params = {
        "linear_w": jax.random.uniform(kw, (C, FEAT), jnp.float32, -scale, scale),
        "linear_b": jax.random.uniform(kb, (C,), jnp.float32, -scale, scale),
    }

    out_resnet = image_model_forward(backbone_out, params, "resnet")
    out_vgg = image_model_forward(backbone_out, params, "vgg")
    jax.block_until_ready((out_resnet, out_vgg))

    # Pure-JAX reference for the module's own computation (dropout == identity).
    ref = backbone_out @ params["linear_w"].T + params["linear_b"]
    assert out_resnet.shape == (B, C) and out_resnet.dtype == jnp.float32
    assert out_vgg.shape == (B, C) and out_vgg.dtype == jnp.float32
    assert bool(jnp.all(jnp.isfinite(out_resnet)))
    assert bool(jnp.allclose(out_resnet, ref, atol=1e-4, rtol=1e-4))
    assert bool(jnp.allclose(out_vgg, ref, atol=1e-4, rtol=1e-4))
    print("KERNEL_OK")
</pallas_src>

<mosaic_0001>
module attributes {stable_mosaic.version = 11 : i64} {
  func.func @_head_kernel(%arg0: i32, %arg1: memref<2x1000xf32, #tpu.memory_space<vmem>>, %arg2: memref<1000x128xf32, #tpu.memory_space<vmem>>, %arg3: memref<1x128xf32, #tpu.memory_space<vmem>>, %arg4: memref<2x128xf32, #tpu.memory_space<vmem>>) attributes {dimension_semantics = [#tpu.dimension_semantics<arbitrary>], iteration_bounds = array<i64: 1>, scalar_prefetch = 0 : i64, scratch_operands = 0 : i64, tpu.core_type = #tpu.core_type<tc>, window_params = [{pipeline_mode = #tpu.pipeline_mode<synchronous>, transform_indices = @transform_0, window_bounds = array<i64: 2, 1000>}, {pipeline_mode = #tpu.pipeline_mode<synchronous>, transform_indices = @transform_1, window_bounds = array<i64: 1000, 128>}, {pipeline_mode = #tpu.pipeline_mode<synchronous>, transform_indices = @transform_2, window_bounds = array<i64: 1, 128>}, {pipeline_mode = #tpu.pipeline_mode<synchronous>, transform_indices = @transform_3, window_bounds = array<i64: 2, 128>}]} {
    %c0 = arith.constant 0 : index
    %c0_0 = arith.constant 0 : index
    %0 = vector.load %arg1[%c0, %c0_0] : memref<2x1000xf32, #tpu.memory_space<vmem>>, vector<2x1000xf32>
    %c0_1 = arith.constant 0 : index
    %c0_2 = arith.constant 0 : index
    %1 = vector.load %arg2[%c0_1, %c0_2] : memref<1000x128xf32, #tpu.memory_space<vmem>>, vector<1000x128xf32>
    %cst = arith.constant dense<0.000000e+00> : vector<2x128xf32>
    %2 = tpu.matmul %0, %1, %cst {dimension_numbers = #tpu.dot_dimension_numbers<[1], [0], [0], [1], [0, 0, 1, 1], [], []>} : vector<2x1000xf32>, vector<1000x128xf32>, vector<2x128xf32> -> vector<2x128xf32>
    %c0_3 = arith.constant 0 : index
    %c0_4 = arith.constant 0 : index
    %3 = vector.load %arg3[%c0_3, %c0_4] : memref<1x128xf32, #tpu.memory_space<vmem>>, vector<1x128xf32>
    %4 = vector.broadcast %3 : vector<1x128xf32> to vector<2x128xf32>
    %5 = arith.addf %2, %4 : vector<2x128xf32>
    %c0_5 = arith.constant 0 : index
    %c0_6 = arith.constant 0 : index
    %6 = vector.load %arg4[%c0_5, %c0_6] : memref<2x128xf32, #tpu.memory_space<vmem>>, vector<2x128xf32>
    tpu.vector_store %arg4[%c0_5, %c0_6], %5 {strides = array<i32>} : memref<2x128xf32, #tpu.memory_space<vmem>>, vector<2x128xf32>,
    return
  }
  func.func @transform_0(%arg0: i32) -> (i32, i32) {
    %c0_i32 = arith.constant 0 : i32
    %c0_i32_0 = arith.constant 0 : i32
    %c0_i32_1 = arith.constant 0 : i32
    return %c0_i32, %c0_i32_0 : i32, i32
  }
  func.func @transform_1(%arg0: i32) -> (i32, i32) {
    %c0_i32 = arith.constant 0 : i32
    %c0_i32_0 = arith.constant 0 : i32
    %c0_i32_1 = arith.constant 0 : i32
    return %c0_i32, %c0_i32_0 : i32, i32
  }
  func.func @transform_2(%arg0: i32) -> (i32, i32) {
    %c0_i32 = arith.constant 0 : i32
    %c0_i32_0 = arith.constant 0 : i32
    %c0_i32_1 = arith.constant 0 : i32
    return %c0_i32, %c0_i32_0 : i32, i32
  }
  func.func @transform_3(%arg0: i32) -> (i32, i32) {
    %c0_i32 = arith.constant 0 : i32
    %c0_i32_0 = arith.constant 0 : i32
    %c0_i32_1 = arith.constant 0 : i32
    return %c0_i32, %c0_i32_0 : i32, i32
  }
}

</mosaic_0001>

<bundles_post_ra>
// kernel: tpu_custom_call.1
= control target key start
LH: loop header
LB: loop body
LE: loop exit
PB: predicated region body
PF: predicated region fallthrough
CT: control target
= control target key end

     0   :  { %8 = vsyncpa [#allocation3], 0  ;;  %s774_s0 = inlined_call_operand.hbm [shape: f32[2,1000], index: 0, kind: input, shape index: {}]   ;;  %s775_s1 = inlined_call_operand.hbm [shape: f32[1000,128], index: 1, kind: input, shape index: {}]   ;;  %s776_s2 = inlined_call_operand.vmem [shape: f32[1,128], index: 2, kind: input, shape index: {}]   ;;  %s777_s3 = inlined_call_operand.hbm [shape: f32[2,128], index: 3, kind: output, shape index: {}]  }
   0x1   :  { %9 = vsyncpa [#allocation6], 0 }
   0x2   :  { %10 = vsyncpa [#allocation4], 0  ;;  %s700_s12 = smov [#allocation2]   ;;  %s701_s14 = smov [#allocation5]  }
   0x3   :  { %s17_s13 = sshll.u32 %s700_s12, 4  ;;  %s26_s15 = sshll.u32 %s701_s14, 4  ;;  %s18_s13 = int_to_ptr.vmem [resolvable:$true] %s17_s13  ;;  %s27_s15 = int_to_ptr.vmem [resolvable:$true] %s26_s15 }
   0x4   :  { %s642_s16 = scalar_lea.vmem %s18_s13, 256  ;;  %p647_p1 = scmp.lt.s32.totalorder %s18_s13, %s18_s13 }
   0x5   :  { %p643_p0 = scmp.ne.s32.totalorder %s18_s13, %s642_s16  ;;  %p648_p2 = scmp.lt.s32.totalorder %s642_s16, %s642_s16 }
   0x7   :  { %p649_p3 = por %p648_p2, %p647_p1 }
   0x9   :  { %p650_p4 = pnand %p649_p3, %p643_p0 }
   0xb   :  { %653 = shalt.err (!%p650_p4)
}
   0xc   :  { %20 = dma.hbm_to_vmem [thread:$0]  %s774_s0, 256, %s18_s13, [#allocation3]  }
   0xd   :  { %s662_s19 = scalar_lea.vmem %s27_s15, 16000  ;;  %p667_p6 = scmp.lt.s32.totalorder %s27_s15, %s27_s15 }
   0xe   :  { %p663_p5 = scmp.ne.s32.totalorder %s27_s15, %s662_s19  ;;  %p668_p7 = scmp.lt.s32.totalorder %s662_s19, %s662_s19 }
  0x10   :  { %p669_p8 = por %p668_p7, %p667_p6 }
  0x12   :  { %p670_p9 = pnand %p669_p8, %p663_p5 }
  0x14   :  { %673 = shalt.err (!%p670_p9)
}
  0x15   :  { %s702_s20 = smov 128   ;;  %s703_s21 = smov 8  }
  0x16   :  { %32 = dma.hbm_to_vmem [thread:$0]  %s775_s1, 16000, %s27_s15, [#allocation6], %s702_s20, %s702_s20, %s703_s21  }
  0x17   :  { %694 = dma.done.wait [#allocation3], 256  }
  0x18   :  { %695 = vsyncadd [#allocation3], 4294967040 }
  0x19   :  { %696 = dma.done.wait [#allocation6], 16000  }
  0x1a   :  { %697 = vsyncadd [#allocation6], 4294951296  ;;  %v74_v0 = vld [vmem:[#allocation5 + $0xf8] sm:$0xff]  ;;  %v73_v4 = vld [vmem:[#allocation5 + $0xf0] sm:$0xff]  ;;  %v704_v30 = vmov 1983009808   ;;  %v181_v32 = vlaneseq }
  0x1b   :  { %v106_v1 = vld [vmem:[#allocation5 + $0x1f8] sm:$0xff]  ;;  %520 = vmatprep.subr.mxu0 %v74_v0  ;;  %v105_v5 = vld [vmem:[#allocation5 + $0x1f0] sm:$0xff]  ;;  %v72_v8 = vld [vmem:[#allocation5 + $0xe8] sm:$0xff]  ;;  %v179_v31 = vunpack.c.l.s4 %v704_v30  ;;  %vm218_vm0 = vcmask 850944   ;;  %s706_s24 = smov [#allocation7]  }
  0x1c   :  { %v58_v2 = vld [vmem:[#allocation5 + $0x78] sm:$0xff]  ;;  %555 = vmatprep.subr.mxu1 %v106_v1  ;;  %v57_v6 = vld [vmem:[#allocation5 + $0x70] sm:$0xff]  ;;  %v104_v9 = vld [vmem:[#allocation5 + $0x1e8] sm:$0xff]  ;;  %v182_v42 = vshrl.u32 %v181_v32, 7  ;;  %s508_s25 = sshll.u32 %s706_s24, 4  ;;  %s509_s25 = int_to_ptr.vmem [resolvable:$true] %s508_s25 }
  0x1d   :  { %v90_v3 = vld [vmem:[#allocation5 + $0x178] sm:$0xff]  ;;  %521 = vmatpush3.msra.mxu0 %v58_v2  ;;  %v89_v7 = vld [vmem:[#allocation5 + $0x170] sm:$0xff]  ;;  %v56_v10 = vld [vmem:[#allocation5 + $0x68] sm:$0xff]  ;;  %v180_v41 = vunpack.c.0.s8 %v179_v31  ;;  %s674_s26 = scalar_lea.vmem %s509_s25, 32  ;;  %p679_p11 = scmp.lt.s32.totalorder %s509_s25, %s509_s25 }
  0x1e   :  { %556 = vmatpush3.msra.mxu1 %v90_v3  ;;  %522 = vmatprep.subr.mxu0 %v73_v4  ;;  %v88_v11 = vld [vmem:[#allocation5 + $0x168] sm:$0xff]  ;;  %v71_v12 = vld [vmem:[#allocation5 + $0xe0] sm:$0xff]  ;;  %v70_v16 = vld [vmem:[#allocation5 + $0xd8] sm:$0xff]  ;;  %p675_p10 = scmp.ne.s32.totalorder %s509_s25, %s674_s26  ;;  %p680_p12 = scmp.lt.s32.totalorder %s674_s26, %s674_s26 }
  0x1f   :  { %557 = vmatprep.subr.mxu1 %v105_v5  ;;  %523 = vmatpush3.msra.mxu0 %v57_v6  ;;  %v103_v13 = vld [vmem:[#allocation5 + $0x1e0] sm:$0xff]  ;;  %v102_v17 = vld [vmem:[#allocation5 + $0x1d8] sm:$0xff]  ;;  %v69_v20 = vld [vmem:[#allocation5 + $0xd0] sm:$0xff]  ;;  %v733_v51 = vsub.s32 %v180_v41, %v182_v42 }
  0x20   :  { %558 = vmatpush3.msra.mxu1 %v89_v7  ;;  %524 = vmatprep.subr.mxu0 %v72_v8  ;;  %v55_v14 = vld [vmem:[#allocation5 + $0x60] sm:$0xff]  ;;  %v54_v18 = vld [vmem:[#allocation5 + $0x58] sm:$0xff]  ;;  %v101_v21 = vld [vmem:[#allocation5 + $0x1d0] sm:$0xff]  ;;  %p681_p13 = por %p680_p12, %p679_p11 }
  0x21   :  { %559 = vmatprep.subr.mxu1 %v104_v9  ;;  %v87_v15 = vld [vmem:[#allocation5 + $0x160] sm:$0xff]  ;;  %525 = vmatpush3.msra.mxu0 %v56_v10  ;;  %v86_v19 = vld [vmem:[#allocation5 + $0x158] sm:$0xff]  ;;  %v53_v22 = vld [vmem:[#allocation5 + $0x50] sm:$0xff] }
  0x22   :  { %560 = vmatpush3.msra.mxu1 %v88_v11  ;;  %526 = vmatprep.subr.mxu0 %v71_v12  ;;  %v85_v23 = vld [vmem:[#allocation5 + $0x150] sm:$0xff]  ;;  %v68_v24 = vld [vmem:[#allocation5 + $0xc8] sm:$0xff]  ;;  %v67_v28 = vld [vmem:[#allocation5 + $0xc0] sm:$0xff]  ;;  %p682_p0 = pnand %p681_p13, %p675_p10 }
  0x23   :  { %561 = vmatprep.subr.mxu1 %v103_v13  ;;  %527 = vmatpush3.msra.mxu0 %v55_v14  ;;  %v100_v25 = vld [vmem:[#allocation5 + $0x1c8] sm:$0xff]  ;;  %v99_v29 = vld [vmem:[#allocation5 + $0x1c0] sm:$0xff]  ;;  %v66_v35 = vld [vmem:[#allocation5 + $0xb8] sm:$0xff] }
  0x24   :  { %562 = vmatpush3.msra.mxu1 %v87_v15  ;;  %528 = vmatprep.subr.mxu0 %v70_v16  ;;  %v52_v26 = vld [vmem:[#allocation5 + $0x48] sm:$0xff]  ;;  %v51_v33 = vld [vmem:[#allocation5 + $0x40] sm:$0xff]  ;;  %v98_v36 = vld [vmem:[#allocation5 + $0x1b8] sm:$0xff]  ;;  %v705_v16 = vmov 0.0  }
  0x25   :  { %563 = vmatprep.subr.mxu1 %v102_v17  ;;  %529 = vmatpush3.msra.mxu0 %v54_v18  ;;  %v84_v27 = vld [vmem:[#allocation5 + $0x148] sm:$0xff]  ;;  %v83_v34 = vld [vmem:[#allocation5 + $0x140] sm:$0xff]  ;;  %v50_v37 = vld [vmem:[#allocation5 + $0x38] sm:$0xff] }
  0x26   :  { %564 = vmatpush3.msra.mxu1 %v86_v19  ;;  %530 = vmatprep.subr.mxu0 %v69_v20  ;;  %v82_v38 = vld [vmem:[#allocation5 + $0x138] sm:$0xff]  ;;  %v65_v39 = vld [vmem:[#allocation5 + $0xb0] sm:$0xff]  ;;  %v64_v45 = vld [vmem:[#allocation5 + $0xa8] sm:$0xff] }
  0x27   :  { %565 = vmatprep.subr.mxu1 %v101_v21  ;;  %531 = vmatpush3.msra.mxu0 %v53_v22  ;;  %v97_v40 = vld [vmem:[#allocation5 + $0x1b0] sm:$0xff]  ;;  %v96_v46 = vld [vmem:[#allocation5 + $0x1a8] sm:$0xff]  ;;  %v63_v49 = vld [vmem:[#allocation5 + $0xa0] sm:$0xff] }
  0x28   :  { %566 = vmatpush3.msra.mxu1 %v85_v23  ;;  %532 = vmatprep.subr.mxu0 %v68_v24  ;;  %v49_v43 = vld [vmem:[#allocation5 + $0x30] sm:$0xff]  ;;  %v48_v47 = vld [vmem:[#allocation5 + $0x28] sm:$0xff]  ;;  %v95_v50 = vld [vmem:[#allocation5 + $0x1a0] sm:$0xff] }
  0x29   :  { %567 = vmatprep.subr.mxu1 %v100_v25  ;;  %533 = vmatpush3.msra.mxu0 %v52_v26  ;;  %v81_v44 = vld [vmem:[#allocation5 + $0x130] sm:$0xff]  ;;  %v80_v48 = vld [vmem:[#allocation5 + $0x128] sm:$0xff]  ;;  %v47_v52 = vld [vmem:[#allocation5 + $0x20] sm:$0xff] }
  0x2a   :  { %568 = vmatpush3.msra.mxu1 %v84_v27  ;;  %534 = vmatprep.subr.mxu0 %v67_v28  ;;  %v79_v53 = vld [vmem:[#allocation5 + $0x120] sm:$0xff]  ;;  %v41_v54 = vld [vmem:[#allocation2] sm:$0xff]  ;;  %v62_v55 = vld [vmem:[#allocation5 + $0x98] sm:$0xff] }
  0x2b   :  { %569 = vmatprep.subr.mxu1 %v99_v29  ;;  %535 = vmatpush3.msra.mxu0 %v51_v33  ;;  %v94_v56 = vld [vmem:[#allocation5 + $0x198] sm:$0xff]  ;;  %v177_v57 = vcombine.high %v41_v54, %v41_v54  ;;  %v61_v60 = vld [vmem:[#allocation5 + $0x90] sm:$0xff]  ;;  %v184_v62 = vrot.slane %v41_v54, %v733_v51  ;;  %v60_v2 = vld [vmem:[#allocation5 + $0x88] sm:$0xff] }
  0x2c   :  { %570 = vmatpush3.msra.mxu1 %v83_v34  ;;  %536 = vmatprep.subr.mxu0 %v66_v35  ;;  %v46_v58 = vld [vmem:[#allocation5 + $0x18] sm:$0xff]  ;;  %v93_v61 = vld [vmem:[#allocation5 + $0x190] sm:$0xff]  ;;  %v92_v3 = vld [vmem:[#allocation5 + $0x188] sm:$0xff] }
  0x2d   :  { %571 = vmatprep.subr.mxu1 %v98_v36  ;;  %537 = vmatpush3.msra.mxu0 %v50_v37  ;;  %v78_v59 = vld [vmem:[#allocation5 + $0x118] sm:$0xff]  ;;  %v45_v63 = vld [vmem:[#allocation5 + $0x10] sm:$0xff]  ;;  %v191_v1 = vrot.slane %v177_v57, %v733_v51  ;;  %v44_v4 = vld [vmem:[#allocation5 + $0x8] sm:$0xff]  ;;  %v192_v8 = vcombine.high %v184_v62, %v184_v62 }
  0x2e   :  { %572 = vmatpush3.msra.mxu1 %v82_v38  ;;  %538 = vmatprep.subr.mxu0 %v65_v39  ;;  %v77_v0 = vld [vmem:[#allocation5 + $0x110] sm:$0xff]  ;;  %v76_v5 = vld [vmem:[#allocation5 + $0x108] sm:$0xff]  ;;  %v59_v6 = vld [vmem:[#allocation5 + $0x80] sm:$0xff] }
  0x2f   :  { %573 = vmatprep.subr.mxu1 %v97_v40  ;;  %539 = vmatpush3.msra.mxu0 %v49_v43  ;;  %v91_v7 = vld [vmem:[#allocation5 + $0x180] sm:$0xff]  ;;  %v193_v10 = vcombine.high %v191_v1, %v191_v1  ;;  %v138_v12 = vld [vmem:[#allocation5 + $0x2f8] sm:$0xff]  ;;  %v137_v15 = vld [vmem:[#allocation5 + $0x2f0] sm:$0xff] }
  0x30   :  { %574 = vmatpush3.msra.mxu1 %v81_v44  ;;  %540 = vmatprep.subr.mxu0 %v64_v45  ;;  %v43_v9 = vld [vmem:[#allocation5] sm:$0xff]  ;;  %v122_v13 = vld [vmem:[#allocation5 + $0x278] sm:$0xff]  ;;  %v121_v17 = vld [vmem:[#allocation5 + $0x270] sm:$0xff] }
  0x31   :  { %575 = vmatprep.subr.mxu1 %v96_v46  ;;  %541 = vmatpush3.msra.mxu0 %v48_v47  ;;  %v75_v11 = vld [vmem:[#allocation5 + $0x100] sm:$0xff]  ;;  %v154_v14 = vld [vmem:[#allocation5 + $0x378] sm:$0xff]  ;;  %v153_v18 = vld [vmem:[#allocation5 + $0x370] sm:$0xff] }
  0x32   :  { %576 = vmatpush3.msra.mxu1 %v80_v48  ;;  %542 = vmatprep.subr.mxu0 %v63_v49  ;;  %v136_v19 = vld [vmem:[#allocation5 + $0x2e8] sm:$0xff]  ;;  %v135_v22 = vld [vmem:[#allocation5 + $0x2e0] sm:$0xff]  ;;  %v134_v25 = vld [vmem:[#allocation5 + $0x2d8] sm:$0xff] }
  0x33   :  { %577 = vmatprep.subr.mxu1 %v95_v50  ;;  %543 = vmatpush3.msra.mxu0 %v47_v52  ;;  %v120_v20 = vld [vmem:[#allocation5 + $0x268] sm:$0xff]  ;;  %v119_v23 = vld [vmem:[#allocation5 + $0x260] sm:$0xff]  ;;  %v118_v26 = vld [vmem:[#allocation5 + $0x258] sm:$0xff] }
  0x34   :  { %578 = vmatpush3.msra.mxu1 %v79_v53  ;;  %544 = vmatprep.subr.mxu0 %v62_v55  ;;  %v152_v21 = vld [vmem:[#allocation5 + $0x368] sm:$0xff]  ;;  %v151_v24 = vld [vmem:[#allocation5 + $0x360] sm:$0xff]  ;;  %v150_v27 = vld [vmem:[#allocation5 + $0x358] sm:$0xff] }
  0x35   :  { %579 = vmatprep.subr.mxu1 %v94_v56  ;;  %545 = vmatpush3.msra.mxu0 %v46_v58  ;;  %v133_v28 = vld [vmem:[#allocation5 + $0x2d0] sm:$0xff]  ;;  %v132_v31 = vld [vmem:[#allocation5 + $0x2c8] sm:$0xff]  ;;  %v131_v34 = vld [vmem:[#allocation5 + $0x2c0] sm:$0xff] }
  0x36   :  { %580 = vmatpush3.msra.mxu1 %v78_v59  ;;  %546 = vmatprep.subr.mxu0 %v61_v60  ;;  %v117_v29 = vld [vmem:[#allocation5 + $0x250] sm:$0xff]  ;;  %v116_v32 = vld [vmem:[#allocation5 + $0x248] sm:$0xff]  ;;  %v115_v35 = vld [vmem:[#allocation5 + $0x240] sm:$0xff] }
  0x37   :  { %581 = vmatprep.subr.mxu1 %v93_v61  ;;  %547 = vmatpush3.msra.mxu0 %v45_v63  ;;  %v149_v30 = vld [vmem:[#allocation5 + $0x350] sm:$0xff]  ;;  %v148_v33 = vld [vmem:[#allocation5 + $0x348] sm:$0xff]  ;;  %v147_v36 = vld [vmem:[#allocation5 + $0x340] sm:$0xff] }
  0x38   :  { %582 = vmatpush3.msra.mxu1 %v77_v0  ;;  %548 = vmatprep.subr.mxu0 %v60_v2  ;;  %v130_v37 = vld [vmem:[#allocation5 + $0x2b8] sm:$0xff]  ;;  %v129_v40 = vld [vmem:[#allocation5 + $0x2b0] sm:$0xff]  ;;  %v128_v43 = vld [vmem:[#allocation5 + $0x2a8] sm:$0xff] }
  0x39   :  { %583 = vmatprep.subr.mxu1 %v92_v3  ;;  %549 = vmatpush3.msra.mxu0 %v44_v4  ;;  %v114_v38 = vld [vmem:[#allocation5 + $0x238] sm:$0xff]  ;;  %v113_v41 = vld [vmem:[#allocation5 + $0x230] sm:$0xff]  ;;  %v112_v44 = vld [vmem:[#allocation5 + $0x228] sm:$0xff] }
  0x3a   :  { %584 = vmatpush3.msra.mxu1 %v76_v5  ;;  %550 = vmatprep.subr.mxu0 %v59_v6  ;;  %v146_v39 = vld [vmem:[#allocation5 + $0x338] sm:$0xff]  ;;  %v145_v42 = vld [vmem:[#allocation5 + $0x330] sm:$0xff]  ;;  %v144_v45 = vld [vmem:[#allocation5 + $0x328] sm:$0xff] }
  0x3b   :  { %585 = vmatprep.subr.mxu1 %v91_v7  ;;  %551 = vmatpush3.msra.mxu0 %v43_v9  ;;  %v127_v46 = vld [vmem:[#allocation5 + $0x2a0] sm:$0xff]  ;;  %v42_v49 = vld [vmem:[#allocation2 + $0x8] sm:$0xff]  ;;  %v125_v55 = vld [vmem:[#allocation5 + $0x290] sm:$0xff] }
  0x3c   :  { %285 = vmatprep.mubr.f32.mxu0 %v192_v8  ;;  %586 = vmatpush3.msra.mxu1 %v75_v11  ;;  %v111_v47 = vld [vmem:[#allocation5 + $0x220] sm:$0xff]  ;;  %v126_v50 = vld [vmem:[#allocation5 + $0x298] sm:$0xff]  ;;  %v194_v52 = vcombine.high %v42_v49, %v42_v49  ;;  %v201_v56 = vrot.slane %v42_v49, %v733_v51  ;;  %v109_v57 = vld [vmem:[#allocation5 + $0x210] sm:$0xff] }
  0x3d   :  { %355 = vmatprep.mubr.f32.mxu1 %v193_v10  ;;  %286 = vmatmul.mubr.f32.vlgmr.msra.gmra.mxu0 %v184_v62  ;;  %v143_v48 = vld [vmem:[#allocation5 + $0x320] sm:$0xff]  ;;  %v110_v53 = vld [vmem:[#allocation5 + $0x218] sm:$0xff]  ;;  %v141_v58 = vld [vmem:[#allocation5 + $0x310] sm:$0xff] }
  0x3e   :  { %356 = vmatmul.mubr.f32.vlgmr.msra.gmra.mxu1 %v191_v1  ;;  %590 = vmatprep.subr.mxu0 %v138_v12  ;;  %v142_v54 = vld [vmem:[#allocation5 + $0x318] sm:$0xff]  ;;  %v124_v59 = vld [vmem:[#allocation5 + $0x288] sm:$0xff]  ;;  %v208_v60 = vrot.slane %v194_v52, %v733_v51  ;;  %v123_v63 = vld [vmem:[#allocation5 + $0x280] sm:$0xff]  ;;  %v209_v0 = vcombine.high %v201_v56, %v201_v56 }
  0x3f   :  { %431 = vmatprep.subr.mxu1 %v705_v16  ;;  %591 = vmatpush3.msra.mxu0 %v122_v13  ;;  %v108_v61 = vld [vmem:[#allocation5 + $0x208] sm:$0xff]  ;;  %v107_v1 = vld [vmem:[#allocation5 + $0x200] sm:$0xff]  ;;  %v166_v4 = vld [vmem:[#allocation5 + $0x3d8] sm:$0xff] }
  0x40   :  { %432 = vmatpush1.msra.mxu1 %v154_v14  ;;  %592 = vmatprep.subr.mxu0 %v137_v15  ;;  %v140_v62 = vld [vmem:[#allocation5 + $0x308] sm:$0xff]  ;;  %v139_v2 = vld [vmem:[#allocation5 + $0x300] sm:$0xff]  ;;  %v210_v3 = vcombine.high %v208_v60, %v208_v60  ;;  %v165_v5 = vld [vmem:[#allocation5 + $0x3d0] sm:$0xff] }
  0x41   :  { %433 = vmatprep.subr.mxu1 %v705_v16  ;;  %593 = vmatpush3.msra.mxu0 %v121_v17  ;;  %v167_v51 = vld [vmem:[#allocation5 + $0x3e0] sm:$0xff]  ;;  %v164_v6 = vld [vmem:[#allocation5 + $0x3c8] sm:$0xff]  ;;  %v162_v8 = vld [vmem:[#allocation5 + $0x3b8] sm:$0xff] }
  0x42   :  { %434 = vmatpush1.msra.mxu1 %v153_v18  ;;  %594 = vmatprep.subr.mxu0 %v136_v19  ;;  %v163_v7 = vld [vmem:[#allocation5 + $0x3c0] sm:$0xff]  ;;  %v161_v9 = vld [vmem:[#allocation5 + $0x3b0] sm:$0xff]  ;;  %v160_v10 = vld [vmem:[#allocation5 + $0x3a8] sm:$0xff] }
  0x43   :  { %435 = vmatprep.subr.mxu1 %v705_v16  ;;  %595 = vmatpush3.msra.mxu0 %v120_v20  ;;  %v159_v11 = vld [vmem:[#allocation5 + $0x3a0] sm:$0xff]  ;;  %v158_v12 = vld [vmem:[#allocation5 + $0x398] sm:$0xff]  ;;  %v157_v13 = vld [vmem:[#allocation5 + $0x390] sm:$0xff] }
  0x44   :  { %436 = vmatpush1.msra.mxu1 %v152_v21  ;;  %596 = vmatprep.subr.mxu0 %v135_v22  ;;  %v156_v14 = vld [vmem:[#allocation5 + $0x388] sm:$0xff]  ;;  %v155_v15 = vld [vmem:[#allocation5 + $0x380] sm:$0xff]  ;;  %v518_v22 = vld [vmem:[%s776_s2] ss:$0 sm:$0xff] }
  0x45   :  { %437 = vmatprep.subr.mxu1 %v705_v16  ;;  %597 = vmatpush3.msra.mxu0 %v119_v23 }
  0x46   :  { %438 = vmatpush1.msra.mxu1 %v151_v24  ;;  %598 = vmatprep.subr.mxu0 %v134_v25 }
  0x47   :  { %439 = vmatprep.subr.mxu1 %v705_v16  ;;  %599 = vmatpush3.msra.mxu0 %v118_v26 }
  0x48   :  { %440 = vmatpush1.msra.mxu1 %v150_v27  ;;  %600 = vmatprep.subr.mxu0 %v133_v28 }
  0x49   :  { %441 = vmatprep.subr.mxu1 %v705_v16  ;;  %601 = vmatpush3.msra.mxu0 %v117_v29 }
  0x4a   :  { %442 = vmatpush1.msra.mxu1 %v149_v30  ;;  %602 = vmatprep.subr.mxu0 %v132_v31 }
  0x4b   :  { %443 = vmatprep.subr.mxu1 %v705_v16  ;;  %603 = vmatpush3.msra.mxu0 %v116_v32 }
  0x4c   :  { %444 = vmatpush1.msra.mxu1 %v148_v33  ;;  %604 = vmatprep.subr.mxu0 %v131_v34 }
  0x4d   :  { %445 = vmatprep.subr.mxu1 %v705_v16  ;;  %605 = vmatpush3.msra.mxu0 %v115_v35 }
  0x4e   :  { %446 = vmatpush1.msra.mxu1 %v147_v36  ;;  %606 = vmatprep.subr.mxu0 %v130_v37 }
  0x4f   :  { %447 = vmatprep.subr.mxu1 %v705_v16  ;;  %607 = vmatpush3.msra.mxu0 %v114_v38 }
  0x50   :  { %448 = vmatpush1.msra.mxu1 %v146_v39  ;;  %608 = vmatprep.subr.mxu0 %v129_v40 }
  0x51   :  { %449 = vmatprep.subr.mxu1 %v705_v16  ;;  %609 = vmatpush3.msra.mxu0 %v113_v41 }
  0x52   :  { %450 = vmatpush1.msra.mxu1 %v145_v42  ;;  %610 = vmatprep.subr.mxu0 %v128_v43 }
  0x53   :  { %451 = vmatprep.subr.mxu1 %v705_v16  ;;  %611 = vmatpush3.msra.mxu0 %v112_v44 }
  0x54   :  { %452 = vmatpush1.msra.mxu1 %v144_v45  ;;  %612 = vmatprep.subr.mxu0 %v127_v46 }
  0x55   :  { %453 = vmatprep.subr.mxu1 %v705_v16  ;;  %613 = vmatpush3.msra.mxu0 %v111_v47 }
  0x56   :  { %454 = vmatpush1.msra.mxu1 %v143_v48  ;;  %614 = vmatprep.subr.mxu0 %v126_v50 }
  0x57   :  { %455 = vmatprep.subr.mxu1 %v705_v16  ;;  %615 = vmatpush3.msra.mxu0 %v110_v53 }
  0x58   :  { %456 = vmatpush1.msra.mxu1 %v142_v54  ;;  %616 = vmatprep.subr.mxu0 %v125_v55 }
  0x59   :  { %457 = vmatprep.subr.mxu1 %v705_v16  ;;  %617 = vmatpush3.msra.mxu0 %v109_v57 }
  0x5a   :  { %458 = vmatpush1.msra.mxu1 %v141_v58  ;;  %618 = vmatprep.subr.mxu0 %v124_v59 }
  0x5b   :  { %459 = vmatprep.subr.mxu1 %v705_v16  ;;  %619 = vmatpush3.msra.mxu0 %v108_v61 }
  0x5c   :  { %460 = vmatpush1.msra.mxu1 %v140_v62  ;;  %620 = vmatprep.subr.mxu0 %v123_v63 }
  0x5d   :  { %461 = vmatprep.subr.mxu1 %v705_v16  ;;  %621 = vmatpush3.msra.mxu0 %v107_v1 }
  0x5e   :  { %425 = vmatprep.mubr.f32.mxu0 %v209_v0  ;;  %462 = vmatpush1.msra.mxu1 %v139_v2 }
  0x5f   :  { %426 = vmatmul.mubr.f32.vlgmr.msra.gmra.mxu0 %v201_v56  ;;  %469 = vmatprep.subr.mxu1 %v705_v16 }
  0x60   :  { %519 = vmatprep.mubr.msk.f32.mxu1 %vm218_vm0, %v210_v3  ;;  %470 = vmatpush2.msra.mxu1 %v167_v51 }
  0x61   :  { %471 = vmatprep.subr.mxu1 %v705_v16 }
  0x62   :  { %472 = vmatpush2.msra.mxu1 %v166_v4 }
  0x63   :  { %473 = vmatprep.subr.mxu1 %v705_v16 }
  0x64   :  { %474 = vmatpush2.msra.mxu1 %v165_v5 }
  0x65   :  { %475 = vmatprep.subr.mxu1 %v705_v16 }
  0x66   :  { %476 = vmatpush2.msra.mxu1 %v164_v6 }
  0x67   :  { %477 = vmatprep.subr.mxu1 %v705_v16 }
  0x68   :  { %478 = vmatpush2.msra.mxu1 %v163_v7 }
  0x69   :  { %479 = vmatprep.subr.mxu1 %v705_v16 }
  0x6a   :  { %480 = vmatpush2.msra.mxu1 %v162_v8 }
  0x6b   :  { %481 = vmatprep.subr.mxu1 %v705_v16 }
  0x6c   :  { %482 = vmatpush2.msra.mxu1 %v161_v9 }
  0x6d   :  { %483 = vmatprep.subr.mxu1 %v705_v16 }
  0x6e   :  { %484 = vmatpush2.msra.mxu1 %v160_v10 }
  0x6f   :  { %485 = vmatprep.subr.mxu1 %v705_v16 }
  0x70   :  { %486 = vmatpush2.msra.mxu1 %v159_v11 }
  0x71   :  { %487 = vmatprep.subr.mxu1 %v705_v16 }
  0x72   :  { %488 = vmatpush2.msra.mxu1 %v158_v12 }
  0x73   :  { %489 = vmatprep.subr.mxu1 %v705_v16 }
  0x74   :  { %490 = vmatpush2.msra.mxu1 %v157_v13 }
  0x75   :  { %491 = vmatprep.subr.mxu1 %v705_v16 }
  0x76   :  { %492 = vmatpush2.msra.mxu1 %v156_v14 }
  0x77   :  { %493 = vmatprep.subr.mxu1 %v705_v16 }
  0x78   :  { %494 = vmatpush2.msra.mxu1 %v155_v15 }
  0x79   :  { %496 = vmatmul.mubr.f32.vlgmr.msra.gmra.mxu1 %v208_v60 }
  0xfd   :  { %v552_v17 = vpop.f32.mrf.mxu0 }
  0xfe   :  { %v587_v19 = vpop.f32.mrf.mxu1 }
  0xff   :  { %v553_v18 = vpop.f32.mrf.mxu0 }
 0x100   :  { %v554_v21 = vadd.f32 %v553_v18, %v552_v17  ;;  %v588_v23 = vpop.f32.mrf.mxu1 }
 0x101   :  { %v589_v26 = vadd.f32 %v588_v23, %v587_v19 }
 0x102   :  { %v288_v25 = vadd.f32 %v554_v21, %v518_v22 }
 0x104   :  { %v358_v28 = vadd.f32 %v589_v26, %v288_v25 }
 0x11f   :  { %v622_v20 = vpop.f32.mrf.mxu0 }
 0x121   :  { %v623_v24 = vpop.f32.mrf.mxu0 }
 0x122   :  { %v624_v27 = vadd.f32 %v623_v24, %v622_v20 }
 0x124   :  { %v428_v16 = vadd.f32 %v624_v27, %v358_v28 }
 0x139   :  { %v497_v29 = vpop.f32.mrf.mxu1 }
 0x13a   :  { %v498_v30 = vadd.f32 %v497_v29, %v428_v16 }
 0x13b   :  { %v499_v31 = vpop.f32.mrf.mxu1 }
 0x13c   :  { %501 = vst [vmem:[#allocation7] sm:$0x3] %v498_v30 }
 0x13d   :  { %685 = shalt.err (!%p682_p0)
}
 0x13e   :  { %511 = dma.vmem_to_hbm [thread:$0]  %s509_s25, 32, %s777_s3, [#allocation4]  }
 0x13f   :  { %698 = dma.done.wait [#allocation4], 32  }
 0x140   :  { %699 = vsyncadd [#allocation4], 4294967264 }
 0x141   :  { %515 = vsyncpa [#allocation3], 1 }
 0x142   :  { %516 = vsyncpa [#allocation6], 1 }
 0x143   :  { %517 = vsyncpa [#allocation4], 1 }

</bundles_post_ra>
